<compile_context>
chip_gen: v7x
topology: tpu7x:2x2x1
jax: 0.10.0
libtpu: 0.0.40
codegen_flags: <defaults>
</compile_context>

<pallas_src>
import functools

import jax
import jax.numpy as jnp
from jax import lax
from jax.experimental import pallas as pl
from jax.experimental.pallas import tpu as pltpu


def _self_attn_kernel(h_ref, bias_ref, wqkv_ref, wo_ref, o_ref,
                      q_scr, k_scr, v_scr, *, heads, dph, block_q):
    # h_ref:    (S, D)        full sequence of one batch element
    # bias_ref: (1, S)        additive attention bias, f32
    # wqkv_ref: (D, 3*inner)  [Wq*scale | Wk | Wv], compute dtype
    # wo_ref:   (inner, D)    compute dtype
    # o_ref:    (block_q, D)  output tile
    # q/k/v_scr: (S, inner)   VMEM scratch, compute dtype, resident per batch
    qi = pl.program_id(1)
    inner = heads * dph

    @pl.when(qi == 0)
    def _():
        # Single fused QKV projection for the whole sequence; MXU operands in
        # the native compute dtype, f32 accumulation.
        qkv = jnp.dot(h_ref[...], wqkv_ref[...],
                      preferred_element_type=jnp.float32)       # (S, 3*inner)
        q_scr[...] = qkv[:, :inner].astype(q_scr.dtype)
        k_scr[...] = qkv[:, inner:2 * inner].astype(k_scr.dtype)
        v_scr[...] = qkv[:, 2 * inner:].astype(v_scr.dtype)

    q_start = pl.multiple_of(qi * block_q, block_q)
    q_rows = q_scr[pl.ds(q_start, block_q), :]                  # (block_q, inner)
    bias = bias_ref[...]                                        # (1, S) f32

    out = jnp.zeros((block_q, o_ref.shape[-1]), jnp.float32)

    # Static loop over heads; per-head output projection is accumulated
    # directly (== concat(heads) @ Wo), avoiding an in-kernel lane concat.
    for hd in range(heads):
        lo, hi = hd * dph, (hd + 1) * dph
        qh = q_rows[:, lo:hi]                                   # (block_q, dph)
        kh = k_scr[:, lo:hi]                                    # (S, dph)
        vh = v_scr[:, lo:hi]                                    # (S, dph)

        # scores = qh @ kh^T (contract on head dim), accumulate in f32.
        s = lax.dot_general(qh, kh, (((1,), (1,)), ((), ())),
                            preferred_element_type=jnp.float32)  # (block_q, S)
        s = s + bias

        # Numerically stable softmax in f32; reciprocal goes to the EUP slot.
        m = jnp.max(s, axis=-1, keepdims=True)
        e = jnp.exp(s - m)
        inv = pl.reciprocal(jnp.sum(e, axis=-1, keepdims=True), approx=True)
        p = (e * inv).astype(vh.dtype)                           # back to MXU dtype

        ctx = jnp.dot(p, vh, preferred_element_type=jnp.float32)  # (block_q, dph)
        out = out + jnp.dot(ctx.astype(wo_ref.dtype), wo_ref[lo:hi, :],
                            preferred_element_type=jnp.float32)   # (block_q, D)

    o_ref[...] = out.astype(o_ref.dtype)


def self_attn_layer(H, wq, wk, wv, wo, heads, mask=None, dropout=0.0,
                    block_q=None, compute_dtype=None):
    """Fused multi-head self-attention layer.

    H:  (B, S, D)
    wq, wk, wv: (D, inner)   -- nn.Linear weights already transposed (x @ W)
    wo: (inner, D)
    mask: optional (B, S) with 1 = keep, 0 = masked (as in extend_mask).
    compute_dtype: dtype fed to the MXU (e.g. jnp.bfloat16); defaults to H.dtype.
    Returns (B, S, D) in H.dtype.
    """
    del dropout  # eval-mode forward: attention dropout is identity.
    B, S, D = H.shape
    inner = wq.shape[1]
    dph = inner // heads
    assert dph * heads == inner
    assert wo.shape == (inner, D)

    cdtype = compute_dtype if compute_dtype is not None else H.dtype

    if block_q is None:
        block_q = min(S, 256)
    if S % block_q != 0:
        # TODO(synk): ragged query tiles (pad + mask) not implemented; fall
        # back to a single query tile per batch element.
        block_q = S
    num_q = S // block_q

    # Fused QKV weight slab with the q scale folded into Wq.
    scale = jnp.float32(dph ** -0.5)
    wqkv = jnp.concatenate(
        [wq.astype(jnp.float32) * scale,
         wk.astype(jnp.float32),
         wv.astype(jnp.float32)], axis=1).astype(cdtype)          # (D, 3*inner)
    wo_c = wo.astype(cdtype)                                      # (inner, D)
    H_c = H.astype(cdtype)

    # Additive attention bias (matches extend_mask()): 0 keep, finfo.min mask.
    if mask is None:
        bias = jnp.zeros((B, 1, S), jnp.float32)
    else:
        bias = ((1.0 - mask.astype(jnp.float32))
                * jnp.finfo(jnp.float32).min).reshape(B, 1, S)

    kernel = functools.partial(_self_attn_kernel, heads=heads, dph=dph,
                               block_q=block_q)

    h_spec = pl.BlockSpec((None, S, D), lambda b, qi: (b, 0, 0))
    bias_spec = pl.BlockSpec((None, 1, S), lambda b, qi: (b, 0, 0))
    wqkv_spec = pl.BlockSpec((D, 3 * inner), lambda b, qi: (0, 0))   # resident
    wo_spec = pl.BlockSpec((inner, D), lambda b, qi: (0, 0))         # resident
    o_spec = pl.BlockSpec((None, block_q, D), lambda b, qi: (b, qi, 0))

    # Explicit VMEM budget: double-buffered weights + activations, 3 scratch
    # slabs, and headroom for the f32 temporaries (qkv / scores / exp / out).
    c_item = jnp.dtype(cdtype).itemsize
    o_item = jnp.dtype(H.dtype).itemsize
    w_bytes = 2 * (D * 3 * inner + inner * D) * c_item
    act_bytes = 2 * (S * D * c_item + S * 4 + block_q * D * o_item)
    scr_bytes = 3 * S * inner * c_item
    tmp_bytes = 4 * (S * 3 * inner + 4 * block_q * S + 2 * block_q * D)
    vmem_limit = min(int(1.5 * (w_bytes + act_bytes + scr_bytes + tmp_bytes))
                     + (8 << 20), 64 << 20)

    out = pl.pallas_call(
        kernel,
        out_shape=jax.ShapeDtypeStruct((B, S, D), H.dtype),
        grid_spec=pltpu.PrefetchScalarGridSpec(
            num_scalar_prefetch=0,
            grid=(B, num_q),
            in_specs=[h_spec, bias_spec, wqkv_spec, wo_spec],
            out_specs=o_spec,
            scratch_shapes=[pltpu.VMEM((S, inner), cdtype),
                            pltpu.VMEM((S, inner), cdtype),
                            pltpu.VMEM((S, inner), cdtype)],
        ),
        compiler_params=pltpu.CompilerParams(
            dimension_semantics=("parallel", "arbitrary"),
            vmem_limit_bytes=vmem_limit),
    )(H_c, bias, wqkv, wo_c)
    return out


def _reference_self_attn(H, wq, wk, wv, wo, heads, mask=None):
    """Pure-JAX reference mirroring the PyTorch forward (eval mode)."""
    B, S, D = H.shape
    inner = wq.shape[1]
    dph = inner // heads

    def shape_(x):
        return x.reshape(B, S, heads, dph).transpose(0, 2, 1, 3)

    hp = "highest"
    q = shape_(jnp.einsum("bsd,de->bse", H, wq, precision=hp)) * (dph ** -0.5)
    k = shape_(jnp.einsum("bsd,de->bse", H, wk, precision=hp))
    v = shape_(jnp.einsum("bsd,de->bse", H, wv, precision=hp))
    scores = jnp.einsum("bhqd,bhkd->bhqk", q, k, precision=hp)
    if mask is not None:
        ext = (1.0 - mask.astype(scores.dtype))[:, None, None, :]
        scores = scores + ext * jnp.finfo(scores.dtype).min
    attn = jax.nn.softmax(scores.astype(jnp.float32), axis=-1).astype(scores.dtype)
    ctx = jnp.einsum("bhqk,bhkd->bhqd", attn, v, precision=hp)
    ctx = ctx.transpose(0, 2, 1, 3).reshape(B, S, inner)
    return jnp.einsum("bse,ed->bsd", ctx, wo, precision=hp)


if __name__ == "__main__":
    key = jax.random.PRNGKey(0)
    B, S, DIM, HEADS = 2, 8, 32, 4

    kh, kq, kk, kv, ko = jax.random.split(key, 5)
    H = jax.random.normal(kh, (B, S, DIM), jnp.float32)
    w_scale = DIM ** -0.5
    wq = jax.random.normal(kq, (DIM, DIM), jnp.float32) * w_scale
    wk = jax.random.normal(kk, (DIM, DIM), jnp.float32) * w_scale
    wv = jax.random.normal(kv, (DIM, DIM), jnp.float32) * w_scale
    wo = jax.random.normal(ko, (DIM, DIM), jnp.float32) * w_scale

    # Case 1: no attention mask (f32 compute; approx reciprocal -> 5e-3 tol).
    out = self_attn_layer(H, wq, wk, wv, wo, HEADS)
    out = jax.block_until_ready(out)
    ref = _reference_self_attn(H, wq, wk, wv, wo, HEADS)
    assert out.shape == (B, S, DIM)
    assert jnp.allclose(out, ref, atol=5e-3, rtol=5e-3), float(
        jnp.max(jnp.abs(out - ref)))

    # Case 2: padding mask (last 3 positions of batch element 1 masked out).
    mask = jnp.ones((B, S), jnp.float32).at[1, 5:].set(0.0)
    out_m = self_attn_layer(H, wq, wk, wv, wo, HEADS, mask=mask)
    out_m = jax.block_until_ready(out_m)
    ref_m = _reference_self_attn(H, wq, wk, wv, wo, HEADS, mask=mask)
    assert jnp.allclose(out_m, ref_m, atol=5e-3, rtol=5e-3), float(
        jnp.max(jnp.abs(out_m - ref_m)))

    # Case 3: bf16 MXU-operand path (coarse sanity check only).
    out_bf = self_attn_layer(H, wq, wk, wv, wo, HEADS, mask=mask,
                             compute_dtype=jnp.bfloat16)
    out_bf = jax.block_until_ready(out_bf)
    assert out_bf.shape == (B, S, DIM)
    assert bool(jnp.all(jnp.isfinite(out_bf)))
    assert float(jnp.max(jnp.abs(out_bf.astype(jnp.float32) - ref_m))) < 0.25

    print("KERNEL_OK")
</pallas_src>

<mosaic_0001>
module attributes {stable_mosaic.version = 11 : i64} {
  func.func @_self_attn_kernel(%arg0: i32, %arg1: i32, %arg2: memref<1x8x32xf32, #tpu.memory_space<vmem>>, %arg3: memref<1x1x8xf32, #tpu.memory_space<vmem>>, %arg4: memref<32x96xf32, #tpu.memory_space<vmem>>, %arg5: memref<32x32xf32, #tpu.memory_space<vmem>>, %arg6: memref<1x8x32xf32, #tpu.memory_space<vmem>>, %arg7: memref<8x32xf32, #tpu.memory_space<vmem>>, %arg8: memref<8x32xf32, #tpu.memory_space<vmem>>, %arg9: memref<8x32xf32, #tpu.memory_space<vmem>>) attributes {dimension_semantics = [#tpu.dimension_semantics<parallel>, #tpu.dimension_semantics<arbitrary>], iteration_bounds = array<i64: 2, 1>, scalar_prefetch = 0 : i64, scratch_operands = 3 : i64, tpu.core_type = #tpu.core_type<tc>, window_params = [{transform_indices = @transform_0, window_bounds = array<i64: 1, 8, 32>}, {transform_indices = @transform_1, window_bounds = array<i64: 1, 1, 8>}, {pipeline_mode = #tpu.pipeline_mode<synchronous>, transform_indices = @transform_2, window_bounds = array<i64: 32, 96>}, {pipeline_mode = #tpu.pipeline_mode<synchronous>, transform_indices = @transform_3, window_bounds = array<i64: 32, 32>}, {transform_indices = @transform_4, window_bounds = array<i64: 1, 8, 32>}]} {
    %c0_i32 = arith.constant 0 : i32
    %0 = arith.cmpi eq, %arg1, %c0_i32 : i32
    %1 = arith.extui %0 : i1 to i32
    %c0_i32_0 = arith.constant 0 : i32
    %2 = arith.cmpi ne, %1, %c0_i32_0 : i32
    scf.if %2 {
      %c0_48 = arith.constant 0 : index
      %c0_49 = arith.constant 0 : index
      %c0_50 = arith.constant 0 : index
      %93 = vector.load %arg2[%c0_48, %c0_49, %c0_50] : memref<1x8x32xf32, #tpu.memory_space<vmem>>, vector<1x8x32xf32>
      %94 = vector.shape_cast %93 : vector<1x8x32xf32> to vector<8x32xf32>
      %c0_51 = arith.constant 0 : index
      %c0_52 = arith.constant 0 : index
      %95 = vector.load %arg4[%c0_51, %c0_52] : memref<32x96xf32, #tpu.memory_space<vmem>>, vector<32x96xf32>
      %cst_53 = arith.constant dense<0.000000e+00> : vector<8x96xf32>
      %96 = tpu.matmul %94, %95, %cst_53 {dimension_numbers = #tpu.dot_dimension_numbers<[1], [0], [0], [1], [0, 0, 1, 1], [], []>} : vector<8x32xf32>, vector<32x96xf32>, vector<8x96xf32> -> vector<8x96xf32>
      %97 = vector.extract_strided_slice %96 {offsets = [0, 0], sizes = [8, 32], strides = [1, 1]} : vector<8x96xf32> to vector<8x32xf32>
      %c0_54 = arith.constant 0 : index
      %c0_55 = arith.constant 0 : index
      %98 = vector.load %arg7[%c0_54, %c0_55] : memref<8x32xf32, #tpu.memory_space<vmem>>, vector<8x32xf32>
      tpu.vector_store %arg7[%c0_54, %c0_55], %97 {strides = array<i32>} : memref<8x32xf32, #tpu.memory_space<vmem>>, vector<8x32xf32>,
      %99 = vector.extract_strided_slice %96 {offsets = [0, 32], sizes = [8, 32], strides = [1, 1]} : vector<8x96xf32> to vector<8x32xf32>
      %c0_56 = arith.constant 0 : index
      %c0_57 = arith.constant 0 : index
      %100 = vector.load %arg8[%c0_56, %c0_57] : memref<8x32xf32, #tpu.memory_space<vmem>>, vector<8x32xf32>
      tpu.vector_store %arg8[%c0_56, %c0_57], %99 {strides = array<i32>} : memref<8x32xf32, #tpu.memory_space<vmem>>, vector<8x32xf32>,
      %101 = vector.extract_strided_slice %96 {offsets = [0, 64], sizes = [8, 32], strides = [1, 1]} : vector<8x96xf32> to vector<8x32xf32>
      %c0_58 = arith.constant 0 : index
      %c0_59 = arith.constant 0 : index
      %102 = vector.load %arg9[%c0_58, %c0_59] : memref<8x32xf32, #tpu.memory_space<vmem>>, vector<8x32xf32>
      tpu.vector_store %arg9[%c0_58, %c0_59], %101 {strides = array<i32>} : memref<8x32xf32, #tpu.memory_space<vmem>>, vector<8x32xf32>,
    } else {
    }
    %c8_i32 = arith.constant 8 : i32
    %3 = arith.muli %arg1, %c8_i32 : i32
    %4 = tpu.assume_multiple %3, 8 : i32
    %5 = arith.index_cast %4 : i32 to index
    %c0 = arith.constant 0 : index
    %6 = vector.load %arg7[%5, %c0] : memref<8x32xf32, #tpu.memory_space<vmem>>, vector<8x32xf32>
    %c0_1 = arith.constant 0 : index
    %c0_2 = arith.constant 0 : index
    %c0_3 = arith.constant 0 : index
    %7 = vector.load %arg3[%c0_1, %c0_2, %c0_3] : memref<1x1x8xf32, #tpu.memory_space<vmem>>, vector<1x1x8xf32>
    %8 = vector.shape_cast %7 : vector<1x1x8xf32> to vector<1x8xf32>
    %cst = arith.constant 0.000000e+00 : f32
    %9 = vector.broadcast %cst : f32 to vector<8x32xf32>
    %10 = vector.extract_strided_slice %6 {offsets = [0, 0], sizes = [8, 8], strides = [1, 1]} : vector<8x32xf32> to vector<8x8xf32>
    %c0_4 = arith.constant 0 : index
    %c0_5 = arith.constant 0 : index
    %11 = vector.load %arg8[%c0_4, %c0_5] : memref<8x32xf32, #tpu.memory_space<vmem>>, vector<8x8xf32>
    %c0_6 = arith.constant 0 : index
    %c0_7 = arith.constant 0 : index
    %12 = vector.load %arg9[%c0_6, %c0_7] : memref<8x32xf32, #tpu.memory_space<vmem>>, vector<8x8xf32>
    %cst_8 = arith.constant dense<0.000000e+00> : vector<8x8xf32>
    %13 = tpu.matmul %10, %11, %cst_8 {dimension_numbers = #tpu.dot_dimension_numbers<[1], [1], [0], [0], [0, 0, 1, 0], [], []>} : vector<8x8xf32>, vector<8x8xf32>, vector<8x8xf32> -> vector<8x8xf32>
    %14 = vector.broadcast %8 : vector<1x8xf32> to vector<8x8xf32>
    %15 = arith.addf %13, %14 : vector<8x8xf32>
    %cst_9 = arith.constant dense<0xFF800000> : vector<8xf32>
    %16 = vector.multi_reduction <maximumf>, %15, %cst_9 [1] : vector<8x8xf32> to vector<8xf32>
    %17 = vector.shape_cast %16 : vector<8xf32> to vector<8x1xf32>
    %18 = vector.broadcast %17 : vector<8x1xf32> to vector<8x8xf32>
    %19 = arith.subf %15, %18 : vector<8x8xf32>
    %20 = math.exp %19 : vector<8x8xf32>
    %cst_10 = arith.constant dense<0.000000e+00> : vector<8xf32>
    %21 = vector.multi_reduction <add>, %20, %cst_10 [1] : vector<8x8xf32> to vector<8xf32>
    %22 = vector.shape_cast %21 : vector<8xf32> to vector<8x1xf32>
    %23 = tpu.reciprocal %22 {approx = true} : vector<8x1xf32> -> vector<8x1xf32>
    %24 = vector.broadcast %23 : vector<8x1xf32> to vector<8x8xf32>
    %25 = arith.mulf %20, %24 : vector<8x8xf32>
    %cst_11 = arith.constant dense<0.000000e+00> : vector<8x8xf32>
    %26 = tpu.matmul %25, %12, %cst_11 {dimension_numbers = #tpu.dot_dimension_numbers<[1], [0], [0], [1], [0, 0, 1, 1], [], []>} : vector<8x8xf32>, vector<8x8xf32>, vector<8x8xf32> -> vector<8x8xf32>
    %c0_12 = arith.constant 0 : index
    %c0_13 = arith.constant 0 : index
    %27 = vector.load %arg5[%c0_12, %c0_13] : memref<32x32xf32, #tpu.memory_space<vmem>>, vector<8x32xf32>
    %cst_14 = arith.constant dense<0.000000e+00> : vector<8x32xf32>
    %28 = tpu.matmul %26, %27, %cst_14 {dimension_numbers = #tpu.dot_dimension_numbers<[1], [0], [0], [1], [0, 0, 1, 1], [], []>} : vector<8x8xf32>, vector<8x32xf32>, vector<8x32xf32> -> vector<8x32xf32>
    %29 = arith.addf %9, %28 : vector<8x32xf32>
    %30 = vector.extract_strided_slice %6 {offsets = [0, 8], sizes = [8, 8], strides = [1, 1]} : vector<8x32xf32> to vector<8x8xf32>
    %c0_15 = arith.constant 0 : index
    %c8 = arith.constant 8 : index
    %31 = vector.load %arg8[%c0_15, %c8] : memref<8x32xf32, #tpu.memory_space<vmem>>, vector<8x8xf32>
    %c0_16 = arith.constant 0 : index
    %c8_17 = arith.constant 8 : index
    %32 = vector.load %arg9[%c0_16, %c8_17] : memref<8x32xf32, #tpu.memory_space<vmem>>, vector<8x8xf32>
    %cst_18 = arith.constant dense<0.000000e+00> : vector<8x8xf32>
    %33 = tpu.matmul %30, %31, %cst_18 {dimension_numbers = #tpu.dot_dimension_numbers<[1], [1], [0], [0], [0, 0, 1, 0], [], []>} : vector<8x8xf32>, vector<8x8xf32>, vector<8x8xf32> -> vector<8x8xf32>
    %34 = vector.broadcast %8 : vector<1x8xf32> to vector<8x8xf32>
    %35 = arith.addf %33, %34 : vector<8x8xf32>
    %cst_19 = arith.constant dense<0xFF800000> : vector<8xf32>
    %36 = vector.multi_reduction <maximumf>, %35, %cst_19 [1] : vector<8x8xf32> to vector<8xf32>
    %37 = vector.shape_cast %36 : vector<8xf32> to vector<8x1xf32>
    %38 = vector.broadcast %37 : vector<8x1xf32> to vector<8x8xf32>
    %39 = arith.subf %35, %38 : vector<8x8xf32>
    %40 = math.exp %39 : vector<8x8xf32>
    %cst_20 = arith.constant dense<0.000000e+00> : vector<8xf32>
    %41 = vector.multi_reduction <add>, %40, %cst_20 [1] : vector<8x8xf32> to vector<8xf32>
    %42 = vector.shape_cast %41 : vector<8xf32> to vector<8x1xf32>
    %43 = tpu.reciprocal %42 {approx = true} : vector<8x1xf32> -> vector<8x1xf32>
    %44 = vector.broadcast %43 : vector<8x1xf32> to vector<8x8xf32>
    %45 = arith.mulf %40, %44 : vector<8x8xf32>
    %cst_21 = arith.constant dense<0.000000e+00> : vector<8x8xf32>
    %46 = tpu.matmul %45, %32, %cst_21 {dimension_numbers = #tpu.dot_dimension_numbers<[1], [0], [0], [1], [0, 0, 1, 1], [], []>} : vector<8x8xf32>, vector<8x8xf32>, vector<8x8xf32> -> vector<8x8xf32>
    %c8_22 = arith.constant 8 : index
    %c0_23 = arith.constant 0 : index
    %47 = vector.load %arg5[%c8_22, %c0_23] : memref<32x32xf32, #tpu.memory_space<vmem>>, vector<8x32xf32>
    %cst_24 = arith.constant dense<0.000000e+00> : vector<8x32xf32>
    %48 = tpu.matmul %46, %47, %cst_24 {dimension_numbers = #tpu.dot_dimension_numbers<[1], [0], [0], [1], [0, 0, 1, 1], [], []>} : vector<8x8xf32>, vector<8x32xf32>, vector<8x32xf32> -> vector<8x32xf32>
    %49 = arith.addf %29, %48 : vector<8x32xf32>
    %50 = vector.extract_strided_slice %6 {offsets = [0, 16], sizes = [8, 8], strides = [1, 1]} : vector<8x32xf32> to vector<8x8xf32>
    %c0_25 = arith.constant 0 : index
    %c16 = arith.constant 16 : index
    %51 = vector.load %arg8[%c0_25, %c16] : memref<8x32xf32, #tpu.memory_space<vmem>>, vector<8x8xf32>
    %c0_26 = arith.constant 0 : index
    %c16_27 = arith.constant 16 : index
    %52 = vector.load %arg9[%c0_26, %c16_27] : memref<8x32xf32, #tpu.memory_space<vmem>>, vector<8x8xf32>
    %cst_28 = arith.constant dense<0.000000e+00> : vector<8x8xf32>
    %53 = tpu.matmul %50, %51, %cst_28 {dimension_numbers = #tpu.dot_dimension_numbers<[1], [1], [0], [0], [0, 0, 1, 0], [], []>} : vector<8x8xf32>, vector<8x8xf32>, vector<8x8xf32> -> vector<8x8xf32>
    %54 = vector.broadcast %8 : vector<1x8xf32> to vector<8x8xf32>
    %55 = arith.addf %53, %54 : vector<8x8xf32>
    %cst_29 = arith.constant dense<0xFF800000> : vector<8xf32>
    %56 = vector.multi_reduction <maximumf>, %55, %cst_29 [1] : vector<8x8xf32> to vector<8xf32>
    %57 = vector.shape_cast %56 : vector<8xf32> to vector<8x1xf32>
    %58 = vector.broadcast %57 : vector<8x1xf32> to vector<8x8xf32>
    %59 = arith.subf %55, %58 : vector<8x8xf32>
    %60 = math.exp %59 : vector<8x8xf32>
    %cst_30 = arith.constant dense<0.000000e+00> : vector<8xf32>
    %61 = vector.multi_reduction <add>, %60, %cst_30 [1] : vector<8x8xf32> to vector<8xf32>
    %62 = vector.shape_cast %61 : vector<8xf32> to vector<8x1xf32>
    %63 = tpu.reciprocal %62 {approx = true} : vector<8x1xf32> -> vector<8x1xf32>
    %64 = vector.broadcast %63 : vector<8x1xf32> to vector<8x8xf32>
    %65 = arith.mulf %60, %64 : vector<8x8xf32>
    %cst_31 = arith.constant dense<0.000000e+00> : vector<8x8xf32>
    %66 = tpu.matmul %65, %52, %cst_31 {dimension_numbers = #tpu.dot_dimension_numbers<[1], [0], [0], [1], [0, 0, 1, 1], [], []>} : vector<8x8xf32>, vector<8x8xf32>, vector<8x8xf32> -> vector<8x8xf32>
    %c16_32 = arith.constant 16 : index
    %c0_33 = arith.constant 0 : index
    %67 = vector.load %arg5[%c16_32, %c0_33] : memref<32x32xf32, #tpu.memory_space<vmem>>, vector<8x32xf32>
    %cst_34 = arith.constant dense<0.000000e+00> : vector<8x32xf32>
    %68 = tpu.matmul %66, %67, %cst_34 {dimension_numbers = #tpu.dot_dimension_numbers<[1], [0], [0], [1], [0, 0, 1, 1], [], []>} : vector<8x8xf32>, vector<8x32xf32>, vector<8x32xf32> -> vector<8x32xf32>
    %69 = arith.addf %49, %68 : vector<8x32xf32>
    %70 = vector.extract_strided_slice %6 {offsets = [0, 24], sizes = [8, 8], strides = [1, 1]} : vector<8x32xf32> to vector<8x8xf32>
    %c0_35 = arith.constant 0 : index
    %c24 = arith.constant 24 : index
    %71 = vector.load %arg8[%c0_35, %c24] : memref<8x32xf32, #tpu.memory_space<vmem>>, vector<8x8xf32>
    %c0_36 = arith.constant 0 : index
    %c24_37 = arith.constant 24 : index
    %72 = vector.load %arg9[%c0_36, %c24_37] : memref<8x32xf32, #tpu.memory_space<vmem>>, vector<8x8xf32>
    %cst_38 = arith.constant dense<0.000000e+00> : vector<8x8xf32>
    %73 = tpu.matmul %70, %71, %cst_38 {dimension_numbers = #tpu.dot_dimension_numbers<[1], [1], [0], [0], [0, 0, 1, 0], [], []>} : vector<8x8xf32>, vector<8x8xf32>, vector<8x8xf32> -> vector<8x8xf32>
    %74 = vector.broadcast %8 : vector<1x8xf32> to vector<8x8xf32>
    %75 = arith.addf %73, %74 : vector<8x8xf32>
    %cst_39 = arith.constant dense<0xFF800000> : vector<8xf32>
    %76 = vector.multi_reduction <maximumf>, %75, %cst_39 [1] : vector<8x8xf32> to vector<8xf32>
    %77 = vector.shape_cast %76 : vector<8xf32> to vector<8x1xf32>
    %78 = vector.broadcast %77 : vector<8x1xf32> to vector<8x8xf32>
    %79 = arith.subf %75, %78 : vector<8x8xf32>
    %80 = math.exp %79 : vector<8x8xf32>
    %cst_40 = arith.constant dense<0.000000e+00> : vector<8xf32>
    %81 = vector.multi_reduction <add>, %80, %cst_40 [1] : vector<8x8xf32> to vector<8xf32>
    %82 = vector.shape_cast %81 : vector<8xf32> to vector<8x1xf32>
    %83 = tpu.reciprocal %82 {approx = true} : vector<8x1xf32> -> vector<8x1xf32>
    %84 = vector.broadcast %83 : vector<8x1xf32> to vector<8x8xf32>
    %85 = arith.mulf %80, %84 : vector<8x8xf32>
    %cst_41 = arith.constant dense<0.000000e+00> : vector<8x8xf32>
    %86 = tpu.matmul %85, %72, %cst_41 {dimension_numbers = #tpu.dot_dimension_numbers<[1], [0], [0], [1], [0, 0, 1, 1], [], []>} : vector<8x8xf32>, vector<8x8xf32>, vector<8x8xf32> -> vector<8x8xf32>
    %c24_42 = arith.constant 24 : index
    %c0_43 = arith.constant 0 : index
    %87 = vector.load %arg5[%c24_42, %c0_43] : memref<32x32xf32, #tpu.memory_space<vmem>>, vector<8x32xf32>
    %cst_44 = arith.constant dense<0.000000e+00> : vector<8x32xf32>
    %88 = tpu.matmul %86, %87, %cst_44 {dimension_numbers = #tpu.dot_dimension_numbers<[1], [0], [0], [1], [0, 0, 1, 1], [], []>} : vector<8x8xf32>, vector<8x32xf32>, vector<8x32xf32> -> vector<8x32xf32>
    %89 = arith.addf %69, %88 : vector<8x32xf32>
    %c0_45 = arith.constant 0 : index
    %c0_46 = arith.constant 0 : index
    %c0_47 = arith.constant 0 : index
    %90 = vector.load %arg6[%c0_45, %c0_46, %c0_47] : memref<1x8x32xf32, #tpu.memory_space<vmem>>, vector<1x8x32xf32>
    %91 = vector.shape_cast %90 : vector<1x8x32xf32> to vector<8x32xf32>
    %92 = vector.shape_cast %89 : vector<8x32xf32> to vector<1x8x32xf32>
    tpu.vector_store %arg6[%c0_45, %c0_46, %c0_47], %92 {strides = array<i32>} : memref<1x8x32xf32, #tpu.memory_space<vmem>>, vector<1x8x32xf32>,
    return
  }
  func.func @transform_0(%arg0: i32, %arg1: i32) -> (i32, i32, i32) {
    %c0_i32 = arith.constant 0 : i32
    %c0_i32_0 = arith.constant 0 : i32
    %c0_i32_1 = arith.constant 0 : i32
    return %arg0, %c0_i32, %c0_i32_0 : i32, i32, i32
  }
  func.func @transform_1(%arg0: i32, %arg1: i32) -> (i32, i32, i32) {
    %c0_i32 = arith.constant 0 : i32
    %c0_i32_0 = arith.constant 0 : i32
    %c0_i32_1 = arith.constant 0 : i32
    return %arg0, %c0_i32, %c0_i32_0 : i32, i32, i32
  }
  func.func @transform_2(%arg0: i32, %arg1: i32) -> (i32, i32) {
    %c0_i32 = arith.constant 0 : i32
    %c0_i32_0 = arith.constant 0 : i32
    %c0_i32_1 = arith.constant 0 : i32
    return %c0_i32, %c0_i32_0 : i32, i32
  }
  func.func @transform_3(%arg0: i32, %arg1: i32) -> (i32, i32) {
    %c0_i32 = arith.constant 0 : i32
    %c0_i32_0 = arith.constant 0 : i32
    %c0_i32_1 = arith.constant 0 : i32
    return %c0_i32, %c0_i32_0 : i32, i32
  }
  func.func @transform_4(%arg0: i32, %arg1: i32) -> (i32, i32, i32) {
    %c0_i32 = arith.constant 0 : i32
    %c0_i32_0 = arith.constant 0 : i32
    return %arg0, %arg1, %c0_i32 : i32, i32, i32
  }
}

</mosaic_0001>

<bundles_post_ra>
// kernel: tpu_custom_call.1
= control target key start
LH: loop header
LB: loop body
LE: loop exit
PB: predicated region body
PF: predicated region fallthrough
CT: control target
= control target key end

     0   :  { %9 = vsyncpa [#allocation6], 0  ;;  %s2281_s0 = inlined_call_operand.hbm [shape: f32[2,8,32], index: 0, kind: input, shape index: {}]   ;;  %s2282_s1 = inlined_call_operand.vmem [shape: f32[2,1,8], index: 1, kind: input, shape index: {}]   ;;  %s2283_s2 = inlined_call_operand.hbm [shape: f32[32,96], index: 2, kind: input, shape index: {}]   ;;  %s2284_s3 = inlined_call_operand.hbm [shape: f32[32,32], index: 3, kind: input, shape index: {}]   ;;  %s2285_s4 = inlined_call_operand.hbm [shape: f32[2,8,32], index: 4, kind: output, shape index: {}]  }
   0x1   :  { %11 = vsyncpa [#allocation6 + $0x1], 0 }
   0x2   :  { %12 = vsyncpa [#allocation9], 0 }
   0x3   :  { %13 = vsyncpa [#allocation7], 0 }
   0x4   :  { %15 = vsyncpa [#allocation7 + $0x1], 0  ;;  %s1925_s15 = smov 0   ;;  %s1927_s16 = smov 0  }
   0x5   :  { %s1929_s17 = smov 0   ;;  %s1931_s18 = smov 0  }
   0x6   :  { %s1933_s19 = smov 0   ;;  %s1935_s20 = smov 0  }
   0x7 LB: > { %s1456_s21 = sadd.s32 4294967295, %s1884_s20   ;;  %s1457_s22 = sadd.s32 4294967294, %s1884_s20   ;;  %s1884_s20 = sphi %s1935_s20, %s21_s20   ;;  %s1880_s19 = sphi %s1933_s19, %s2307_s19   ;;  %s1876_s18 = sphi %s1931_s18, %s2306_s18   ;;  %s1872_s17 = sphi %s1929_s17, %s2305_s17   ;;  %s1868_s16 = sphi %s1927_s16, %s2304_s16   ;;  %s1864_s15 = sphi %s1925_s15, %s2303_s15  }
   0x8   : > { %p53_p0 = scmp.ne.s32.totalorder %s1868_s16, %s1864_s15  ;;  %p1959_p1 = scmp.eq.s32.totalorder %s1456_s21, 0 }
   0x9   : > { %p1963_p2 = scmp.eq.s32.totalorder %s1456_s21, 1  ;;  %p153_p3 = scmp.eq.s32.totalorder %s1457_s22, 1 }
   0xa   : > { %s2290_s23 = scalar_select %p1959_p1, 1, 0 }
   0xb   : > { %p1969_p4 = por %p1959_p1, %p53_p0  ;;  %p1458_p5 = scmp.ge.s32.totalorder %s1884_s20, 1 }
   0xc   : > { %p1974_p6 = por %p153_p3, %p53_p0  ;;  %p160_p7 = scmp.lt.s32.totalorder %s1884_s20, 3 }
   0xd   : > { %s2292_s25 = scalar_select %p1969_p4, 1, 0 }
   0xe   : > { %s2293_s26 = scalar_select %p1974_p6, 1, 0 }
   0xf   : > { %p1979_p8 = pnand %p1458_p5, %p160_p7  ;;  %s1886_s28 = smov [#allocation8]  }
  0x10   : > { %s172_s29 = sshll.u32 %s1886_s28, 4  ;;  %s1887_s5 = smov [#allocation10]   ;;  %s1983_s29 = int_to_ptr.vmem [resolvable:$true] %s172_s29 }
  0x11   : > { %p1615_p9 = pneg %p1979_p8  ;;  %s185_s6 = sshll.u32 %s1887_s5, 4  ;;  %s1994_s6 = int_to_ptr.vmem [resolvable:$true] %s185_s6 }
  0x12   : > { %s1712_s9 = scalar_lea.hbm %s2283_s2, 512 }
  0x13   : > { %p1990_p11 = pnand %p1615_p9, %p1959_p1  ;;  %p1713_p12 = scmp.ne.s32.totalorder %s2283_s2, %s1712_s9 }
  0x14   : > { %p1719_p5 = scmp.lt.u32.totalorder %s1712_s9, %s2283_s2 }
  0x15   : > { %p1714_p13 = pneg %p1990_p11 }
  0x17   : > { %p1715_p0 = pnand %p1714_p13, %p1713_p12 }
  0x19   : > { %p1716_p3 = pneg %p1715_p0 }
  0x1b   : > { %p1721_p7 = pnand %p1719_p5, %p1716_p3 }
  0x1d   : > { %1724 = shalt.err (!%p1721_p7)
}
  0x1e   : > { %s1725_s14 = scalar_lea.vmem %s1983_s29, 512  ;;  %p1733_p1 = scmp.lt.s32.totalorder %s1983_s29, %s1983_s29 }
  0x1f   : > { %p1726_p9 = scmp.ne.s32.totalorder %s1983_s29, %s1725_s14  ;;  %p1734_p12 = scmp.lt.s32.totalorder %s1725_s14, %s1725_s14 }
  0x21   : > { %p1728_p10 = pnand %p1726_p9, %p1714_p13  ;;  %p1735_p0 = por %p1734_p12, %p1733_p1 }
  0x23   : > { %p1729_p6 = pneg %p1728_p10 }
  0x25   : > { %p1736_p4 = pnand %p1735_p0, %p1729_p6 }
  0x27   : > { %1739 = shalt.err (!%p1736_p4)
}
  0x28   : > { %s1888_s21 = smov 128   ;;  %s1889_s22 = smov 8  }
  0x29   : > { %1618 = dma.hbm_to_vmem [thread:$0]  (!%p1990_p11), %s2283_s2, 512, %s1983_s29, [#allocation9], %s1888_s21, %s1888_s21, %s1889_s22  }
  0x2a   : > { %s1740_s9 = scalar_lea.hbm %s2284_s3, 512 }
  0x2b   : > { %p1741_p1 = scmp.ne.s32.totalorder %s2284_s3, %s1740_s9  ;;  %p1747_p10 = scmp.lt.u32.totalorder %s1740_s9, %s2284_s3 }
  0x2d   : > { %p1743_p4 = pnand %p1741_p1, %p1714_p13 }
  0x2f   : > { %p1744_p6 = pneg %p1743_p4 }
  0x31   : > { %p1749_p3 = pnand %p1747_p10, %p1744_p6 }
  0x33   : > { %1752 = shalt.err (!%p1749_p3)
}
  0x34   : > { %s1753_s29 = scalar_lea.vmem %s1994_s6, 512  ;;  %p1761_p12 = scmp.lt.s32.totalorder %s1994_s6, %s1994_s6 }
  0x35   : > { %p1754_p5 = scmp.ne.s32.totalorder %s1994_s6, %s1753_s29  ;;  %p1762_p0 = scmp.lt.s32.totalorder %s1753_s29, %s1753_s29 }
  0x37   : > { %p1756_p7 = pnand %p1754_p5, %p1714_p13  ;;  %p1763_p1 = por %p1762_p0, %p1761_p12 }
  0x39   : > { %p1757_p9 = pneg %p1756_p7 }
  0x3b   : > { %p1764_p4 = pnand %p1763_p1, %p1757_p9 }
  0x3d   : > { %1767 = shalt.err (!%p1764_p4)
}
  0x3e   : > { %1621 = dma.hbm_to_vmem [thread:$0]  (!%p1990_p11), %s2284_s3, 512, %s1994_s6, [#allocation9], %s1888_s21, %s1888_s21, %s1889_s22  }
  0x3f   : > { %s33_s5 = sadd.s32 1, %s1880_s19  ;;  %s40_s7 = sadd.s32 1, %s1872_s17 }
  0x40   : > { %p35_p13 = scmp.ge.s32.totalorder %s33_s5, 2  ;;  %p47_p6 = scmp.ne.s32.totalorder %s1872_s17, %s1868_s16 }
  0x41   : > { %p48_p10 = scmp.eq.s32.totalorder %s1884_s20, 0  ;;  %p1632_p3 = scmp.lt.s32.totalorder %s1884_s20, 2 }
  0x42   : > { %s2309_s5 = smov (%p35_p13, %s33_s5), 0  ;;  %p2058_p7 = por %p1963_p2, %p47_p6 }
  0x43   : > { %p49_p5 = por %p48_p10, %p47_p6  ;;  %s37_s8 = ssub.s32 %s1880_s19, %s2309_s5 }
  0x44   : > { %s2296_s30 = scalar_select %p2058_p7, 1, 0 }
  0x45   : > { %s199_s9 = sand.u32 1, %s1872_s17   ;;  %p38_p9 = scmp.eq.s32.totalorder %s37_s8, 0 }
  0x46   : > { %s1462_s6 = sshll.u32 %s199_s9, 3  ;;  %s1463_s21 = sshll.u32 %s1880_s19, 7 }
  0x47   : > { %s2067_s22 = scalar_select %p38_p9, %s1872_s17, %s40_s7  }
  0x48   : > { %s2072_s12 = scalar_lea.hbm %s2281_s0, %s1463_s21  ;;  %s203_s24 = scalar_lea.vmem [#allocation5], %s1462_s6 }
  0x49   : > { %s210_s13 = sshll.u32 %s203_s24, 4  ;;  %p2076_p2 = pnand %p1632_p3, %p49_p5  ;;  %s2080_s13 = int_to_ptr.vmem [resolvable:$true] %s210_s13 }
  0x4a   : > { %s200_s14 = scalar_lea.sflag [#allocation6], %s199_s9  ;;  %s1768_s28 = scalar_lea.hbm %s2072_s12, 128 }
  0x4b   : > { %p1769_p11 = scmp.ne.s32.totalorder %s2072_s12, %s1768_s28  ;;  %p1770_p12 = pneg %p2076_p2 }
  0x4c   : > { %s1773_s6 = scalar_lea.hbm %s2281_s0, 256  ;;  %p1774_p4 = scmp.lt.u32.totalorder %s2072_s12, %s2281_s0 }
  0x4d   : > { %p1771_p0 = pnand %p1770_p12, %p1769_p11  ;;  %p1775_p13 = scmp.lt.u32.totalorder %s1773_s6, %s1768_s28 }
  0x4e   : > { %p1777_p10 = scmp.lt.u32.totalorder %s1768_s28, %s2072_s12 }
  0x4f   : > { %p1772_p1 = pneg %p1771_p0  ;;  %p1776_p6 = por %p1775_p13, %p1774_p4 }
  0x51   : > { %p1778_p3 = por %p1777_p10, %p1776_p6 }
  0x53   : > { %p1779_p5 = pnand %p1778_p3, %p1772_p1 }
  0x55   : > { %1782 = shalt.err (!%p1779_p5)
}
  0x56   : > { %s1783_s9 = scalar_lea.vmem %s2080_s13, 128  ;;  %s1890_s11 = smov [#allocation5]  }
  0x57   : > { %p1784_p9 = scmp.ne.s32.totalorder %s2080_s13, %s1783_s9  ;;  %s1788_s24 = sshll.u32 %s1890_s11, 4  ;;  %s1789_s24 = int_to_ptr.vmem [resolvable:$false] %s1788_s24 }
  0x58   : > { %s1790_s7 = scalar_lea.vmem %s1789_s24, 256  ;;  %p1791_p7 = scmp.lt.s32.totalorder %s2080_s13, %s1789_s24 }
  0x59   : > { %p1786_p11 = pnand %p1784_p9, %p1770_p12  ;;  %p1792_p4 = scmp.lt.s32.totalorder %s1790_s7, %s1783_s9 }
  0x5b   : > { %p1787_p0 = pneg %p1786_p11  ;;  %p1793_p13 = por %p1792_p4, %p1791_p7 }
  0x5d   : > { %p1794_p6 = pnand %p1793_p13, %p1787_p0 }
  0x5f   : > { %1797 = shalt.err (!%p1794_p6)
}
  0x60   : > { %1625 = dma.hbm_to_vmem [thread:$0]  (!%p2076_p2), %s2072_s12, 128, %s2080_s13, %s200_s14  }
  0x61   : > { %225 = sbr.rel (%p1979_p8) target bundleno = 3019 (0xbcb), region = 36  ;;  %s2110_s28 = sand.u32 (!%p1979_p8), 1, %s1868_s16  }
  0x62   : > { %s1465_s8 = sshll.u32 (!%p1979_p8), %s2110_s28, 3  ;;  %s228_s6 = scalar_lea.sflag (!%p1979_p8), [#allocation6], %s2110_s28 }
  0x63   : > { %s231_s21 = scalar_lea.vmem (!%p1979_p8), [#allocation5], %s1465_s8  ;;  %p2298_p7 = scmp.ne.s32.totalorder (!%p1979_p8), %s2292_s25, 0 }
  0x68   : > { %1851 = dma.done.wait (%p2298_p7), %s228_s6, 128  }
  0x69   : > { %1853 = vsyncadd (%p2298_p7), %s228_s6, 4294967168  ;;  %p2299_p2 = scmp.ne.s32.totalorder %s2290_s23, 0 }
  0x6b   : > { %1855 = dma.done.wait (%p2299_p2), [#allocation9], 1024  }
  0x6c   : > { %1857 = vsyncadd (%p2299_p2), [#allocation9], 4294966272  ;;  %v1891_v0 = vmov 0.0|0.0   ;;  %vm1892_vm0 = vmmov 0   ;;  %v1893_v1 = vmov 0.0   ;;  %v275_v2 = vld [vmem:[#allocation8] sm:$0xff] }
  0x6d   : > { %1591 = vmatprep.subr.bf16.mxu0 %v1891_v0  ;;  %1528 = vmatprep.mubr.msk.f32.mxu0 %vm1892_vm0, %v1893_v1  ;;  %v276_v3 = vld [vmem:[#allocation8 + $0x8] sm:$0xff]  ;;  %v277_v4 = vld [vmem:[#allocation8 + $0x10] sm:$0xff]  ;;  %v278_v6 = vld [vmem:[#allocation8 + $0x18] sm:$0xff]  ;;  %vm279_vm1 = vcmask 261120   ;;  %s1894_s23 = smov 64   ;;  %s1895_s25 = smov 96  }
  0x6e   : > { %1531 = vmatprep.subr.mxu1 %v1893_v1  ;;  %1533 = vmatprep.mubr.msk.f32.mxu1 %vm1892_vm0, %v1893_v1  ;;  %v1592_v5 = vpack.c.bf16 %v276_v3, %v275_v2  ;;  %v1595_v7 = vpack.c.bf16 %v278_v6, %v277_v4  ;;  %v274_v8 = vld [vmem:[%s231_s21] sm:$0xff]  ;;  %vm375_vm2 = vcmask 64512   ;;  %s1896_s27 = smov 120   ;;  %p267_p8 = scmp.lt.s32.totalorder %s1876_s18, 1  ;;  %v703_v48 = vld [vmem:[#allocation10 + $0x8] sm:$0xff]  ;;  %v536_v49 = vld [vmem:[#allocation10] sm:$0xff] }
  0x6f   : > { %s1897_s10 = smov 112   ;;  %s1898_s9 = smov 104   ;;  %v1015_v4 = vld [vmem:[#allocation10 + $0x10] sm:$0xff] }
  0x70   : > { %1593 = vmatpush3.bf16.msra.mxu0 %v1592_v5  ;;  %s268_s12 = scalar_select %p267_p8, %s1876_s18, 1 }
  0x71   : > { %1594 = vmatprep.subr.bf16.mxu0 %v1891_v0  ;;  %s1488_s11 = sshll.u32 %s1876_s18, 7  ;;  %s266_s24 = scalar_lea.vmem [#allocation11], %s1465_s8 }
  0x72   : > { %s269_s14 = scalar_lea.vmem %s2282_s1, %s268_s12  ;;  %s1347_s7 = sshll.u32 %s266_s24, 4  ;;  %s2233_s7 = int_to_ptr.vmem [resolvable:$true] %s1347_s7 }
  0x73   : > { %v2157_v16 = vld [vmem:[%s269_s14] ss:$0 sm:$0xff]  ;;  %p2300_p1 = scmp.ne.s32.totalorder %s2296_s30, 0  ;;  %s1899_s18 = smov [#allocation11]  }
  0x74   : > { %1596 = vmatpush3.bf16.msra.mxu0 %v1595_v7  ;;  %s1802_s8 = sshll.u32 %s1899_s18, 4  ;;  %s1803_s8 = int_to_ptr.vmem [resolvable:$false] %s1802_s8 }
  0x75   : > { %1551 = vmatprep.subr.mxu0 %v1893_v1  ;;  %s1804_s12 = scalar_lea.vmem %s1803_s8, 256  ;;  %p1805_p5 = scmp.lt.s32.totalorder %s2233_s7, %s1803_s8 }
  0x77   : > { %1529 = vmatmul.mubr.msk.f32.vlgmr.msra.gmra.mrb[0].mxu0 %vm279_vm1, %v274_v8 }
  0x78   : > { %1553 = vmatprep.mubr.msk.f32.mxu0 %vm1892_vm0, %v1893_v1  ;;  %1552 = vmatpush3.msra.mxu0 %v703_v48 }
  0x79   : > { %1556 = vmatprep.subr.mxu0 %v1893_v1 }
 0x14a   : > { %v349_v9 = vpop.f32.mrb[0].mxu0 }
 0x14b   : > { %353 = vst.msk [vmem:[#allocation2] sm:$0xff] %vm279_vm1, %v349_v9  ;;  %359 = vrot.lane.b32.xlu1 %v349_v9, %s1894_s23  ;;  %355 = vrot.lane.b32.xlu0 %v349_v9, %s1895_s25  ;;  %v1530_v10 = vpop.f32.mrb[1].mxu0  ;;  %s2231_s23 = scalar_lea.hbm %s2285_s4, %s1488_s11  ;;  %s1333_s25 = scalar_lea.sflag [#allocation7], %s2110_s28 }
 0x152   : > { %v2142_v14 = vld [vmem:[#allocation2] sm:$0xff] }
 0x1bd   : > { %v360_v11 = vpop.permute.xlu1 %359  ;;  %v356_v12 = vpop.permute.xlu0 %355 }
 0x1be   : > { %362 = vst.msk [vmem:[#allocation4] sm:$0xff] %vm279_vm1, %v360_v11  ;;  %358 = vst.msk [vmem:[#allocation3] sm:$0xff] %vm279_vm1, %v356_v12 }
 0x1c5   : > { %v2136_v13 = vld [vmem:[#allocation3] sm:$0xff]  ;;  %v2146_v15 = vld [vmem:[#allocation4] sm:$0xff] }
 0x1c6   : > { %539 = vrot.lane.b32.xlu1 %v2136_v13, %s1896_s27  ;;  %1532 = vmatpush3.xpose.msk.msra.mxu1 %vm375_vm2, %v2136_v13 }
 0x1c7   : > { %1536 = vmatprep.subr.mxu1 %v1893_v1 }
 0x1c9   : > { %1534 = vmatmul.mubr.msk.f32.vlgmr.msra.gmra.mrb[0].mxu1 %vm375_vm2, %v2142_v14 }
 0x1ca   : > { %1537 = vmatpush3.msra.mxu1 %v2146_v15  ;;  %1538 = vmatprep.mubr.msk.f32.mxu1 %vm1892_vm0, %v1893_v1 }
 0x1cb   : > { %1541 = vmatprep.subr.mxu1 %v1893_v1 }
 0x238   : > { %v540_v26 = vpop.permute.xlu1 %539 }
 0x29c   : > { %v448_v17 = vpop.f32.mrb[0].mxu1 }
 0x29d   : > { %v449_v18 = vadd.f32 %v2157_v16, %v448_v17  ;;  %v1535_v19 = vpop.f32.mrb[1].mxu1 }
 0x29f   : > { %v452_v20 = vsel %vm375_vm2, %v449_v18, -inf }
 0x2a0   : > { %453 = vmax.xlane.f32.xlu0 %v452_v20 }
 0x2b6   : > { %627 = vrot.lane.b32.xlu0 %v2146_v15, %s1896_s27 }
 0x2ba   : > { %852 = vrot.lane.b32.xlu0 %v2136_v13, %s1897_s10 }
 0x32d   : > { %v454_v21 = vpop.xlane.xlu0 %453 }
 0x32e   : > { %v455_v22 = vsub.f32 %v449_v18, %v454_v21  ;;  %v1255_v21 = vld [vmem:[#allocation10 + $0x18] sm:$0xff] }
 0x330   : > { %v456_v23 = vmul.f32 1.442695, %v455_v22 }
 0x331   : > { %v628_v31 = vpop.permute.xlu0 %627 }
 0x332   : > { %1696 = vpow2.f32 %v456_v23 }
 0x335   : > { %v853_v43 = vpop.permute.xlu0 %852 }
 0x33c   : > { %v1697_v24 = vpop.eup %1696 }
 0x33d   : > { %v458_v25 = vsel %vm375_vm2, %v1697_v24, 0.0 }
 0x33e   : > { %459 = vadd.xlane.f32.xlu1 %v458_v25 }
 0x34f   : > { %537 = vrot.lane.b32.xlu1 %v2142_v14, %s1896_s27  ;;  %s1798_s27 = scalar_lea.vmem %s2233_s7, 128 }
 0x350   : > { %p1799_p12 = scmp.ne.s32.totalorder %s2233_s7, %s1798_s27  ;;  %p1806_p9 = scmp.lt.s32.totalorder %s1804_s12, %s1798_s27 }
 0x352   : > { %p1800_p10 = pnand %p1799_p12, %p2300_p1  ;;  %p1807_p11 = por %p1806_p9, %p1805_p5 }
 0x354   : > { %p1801_p3 = pneg %p1800_p10 }
 0x356   : > { %p1808_p0 = pnand %p1807_p11, %p1801_p3 }
 0x3cb   : > { %v460_v27 = vpop.xlane.xlu1 %459 }
 0x3cc   : > { %1698 = vrcp.f32 %v460_v27 }
 0x3cf   : > { %v538_v30 = vpop.permute.xlu1 %537 }
 0x3d6   : > { %v1699_v28 = vpop.eup %1698 }
 0x3d7   : > { %v462_v29 = vmul.f32 %v1699_v28, %v1697_v24 }
 0x3d9   : > { %1539 = vmatmul.mubr.msk.f32.vlgmr.msra.gmra.mrb[2].mxu1 %vm375_vm2, %v462_v29 }
 0x3da   : > { %1542 = vmatpush3.xpose.msk.msra.mxu1 %vm375_vm2, %v540_v26  ;;  %1543 = vmatprep.mubr.msk.f32.mxu1 %vm1892_vm0, %v1893_v1 }
 0x3db   : > { %1546 = vmatprep.subr.mxu1 %v1893_v1 }
 0x3dd   : > { %1544 = vmatmul.mubr.msk.f32.vlgmr.msra.gmra.mrb[4].mxu1 %vm375_vm2, %v538_v30 }
 0x3de   : > { %1547 = vmatpush3.msra.mxu1 %v628_v31  ;;  %1548 = vmatprep.mubr.msk.f32.mxu1 %vm1892_vm0, %v1893_v1 }
 0x3df   : > { %1561 = vmatprep.subr.mxu1 %v1893_v1 }
 0x4ac   : > { %v532_v32 = vpop.f32.mrb[2].mxu1 }
 0x4ad   : > { %v1540_v33 = vpop.f32.mrb[3].mxu1 }
 0x4b0   : > { %v611_v34 = vpop.f32.mrb[4].mxu1 }
 0x4b1   : > { %v612_v35 = vadd.f32 %v2157_v16, %v611_v34  ;;  %v1545_v36 = vpop.f32.mrb[5].mxu1 }
 0x4b3   : > { %v615_v37 = vsel %vm375_vm2, %v612_v35, -inf }
 0x4b4   : > { %616 = vmax.xlane.f32.xlu1 %v615_v37 }
 0x541   : > { %v617_v38 = vpop.xlane.xlu1 %616 }
 0x542   : > { %v618_v39 = vsub.f32 %v612_v35, %v617_v38 }
 0x544   : > { %v619_v40 = vmul.f32 1.442695, %v618_v39 }
 0x546   : > { %1700 = vpow2.f32 %v619_v40 }
 0x550   : > { %v1701_v41 = vpop.eup %1700 }
 0x551   : > { %v621_v42 = vsel %vm375_vm2, %v1701_v41, 0.0 }
 0x552   : > { %622 = vadd.xlane.f32.xlu0 %v621_v42 }
 0x568   : > { %850 = vrot.lane.b32.xlu0 %v2142_v14, %s1897_s10 }
 0x5df   : > { %v623_v44 = vpop.xlane.xlu0 %622 }
 0x5e0   : > { %1702 = vrcp.f32 %v623_v44 }
 0x5e3   : > { %v851_v47 = vpop.permute.xlu0 %850 }
 0x5ea   : > { %v1703_v45 = vpop.eup %1702 }
 0x5eb   : > { %v625_v46 = vmul.f32 %v1703_v45, %v1701_v41 }
 0x5ed   : > { %1549 = vmatmul.mubr.msk.f32.vlgmr.msra.gmra.mrb[6].mxu1 %vm375_vm2, %v625_v46 }
 0x5ee   : > { %1562 = vmatpush3.xpose.msk.msra.mxu1 %vm375_vm2, %v853_v43  ;;  %1563 = vmatprep.mubr.msk.f32.mxu1 %vm1892_vm0, %v1893_v1 }
 0x5ef   : > { %1566 = vmatprep.subr.mxu1 %v1893_v1 }
 0x5f1   : > { %1564 = vmatmul.mubr.msk.f32.vlgmr.msra.gmra.mrb[8].mxu1 %vm375_vm2, %v851_v47 }
 0x5f2   : > { %1568 = vmatprep.mubr.msk.f32.mxu1 %vm1892_vm0, %v1893_v1 }
 0x6c0   : > { %v699_v50 = vpop.f32.mrb[6].mxu1 }
 0x6c1   : > { %v1550_v51 = vpop.f32.mrb[7].mxu1  ;;  %1554 = vmatmul.mubr.msk.f32.vlgmr.msra.gmra.mrb[2].mxu0 %vm375_vm2, %v699_v50 }
 0x6c2   : > { %1557 = vmatpush3.msra.mxu0 %v536_v49  ;;  %1558 = vmatprep.mubr.msk.f32.mxu0 %vm1892_vm0, %v1893_v1 }
 0x6c3   : > { %1571 = vmatprep.subr.mxu0 %v1893_v1 }
 0x6c4   : > { %v924_v52 = vpop.f32.mrb[8].mxu1 }
 0x6c5   : > { %v925_v53 = vadd.f32 %v2157_v16, %v924_v52  ;;  %v1565_v54 = vpop.f32.mrb[9].mxu1 }
 0x6c7   : > { %v928_v55 = vsel %vm375_vm2, %v925_v53, -inf }
 0x6c8   : > { %929 = vmax.xlane.f32.xlu1 %v928_v55 }
 0x6c9   : > { %1559 = vmatmul.mubr.msk.f32.vlgmr.msra.gmra.mrb[2].mxu0 %vm375_vm2, %v532_v32 }
 0x6ca   : > { %1573 = vmatprep.mubr.msk.f32.mxu0 %vm1892_vm0, %v1893_v1  ;;  %1572 = vmatpush3.msra.mxu0 %v1015_v4 }
 0x6cb   : > { %1581 = vmatprep.subr.mxu0 %v1893_v1 }
 0x6d9   : > { %939 = vrot.lane.b32.xlu1 %v2146_v15, %s1897_s10 }
 0x6dd   : > { %1092 = vrot.lane.b32.xlu1 %v2136_v13, %s1898_s9 }
 0x6e1   : > { %1090 = vrot.lane.b32.xlu1 %v2142_v14, %s1898_s9 }
 0x755   : > { %v930_v56 = vpop.xlane.xlu1 %929 }
 0x756   : > { %v931_v57 = vsub.f32 %v925_v53, %v930_v56 }
 0x758   : > { %v932_v58 = vmul.f32 1.442695, %v931_v57 }
 0x759   : > { %v940_v59 = vpop.permute.xlu1 %939 }
 0x75a   : > { %1704 = vpow2.f32 %v932_v58  ;;  %1567 = vmatpush3.msra.mxu1 %v940_v59 }
 0x75b   : > { %1576 = vmatprep.subr.mxu1 %v1893_v1 }
 0x75d   : > { %v1093_v0 = vpop.permute.xlu1 %1092 }
 0x761   : > { %v1091_v3 = vpop.permute.xlu1 %1090 }
 0x764   : > { %v1705_v60 = vpop.eup %1704 }
 0x765   : > { %v934_v61 = vsel %vm375_vm2, %v1705_v60, 0.0 }
 0x766   : > { %935 = vadd.xlane.f32.xlu0 %v934_v61 }
 0x7f3   : > { %v936_v62 = vpop.xlane.xlu0 %935 }
 0x7f4   : > { %1706 = vrcp.f32 %v936_v62 }
 0x7fe   : > { %v1707_v63 = vpop.eup %1706 }
 0x7ff   : > { %v938_v2 = vmul.f32 %v1707_v63, %v1705_v60 }
 0x801   : > { %1569 = vmatmul.mubr.msk.f32.vlgmr.msra.gmra.mrb[10].mxu1 %vm375_vm2, %v938_v2 }
 0x802   : > { %1577 = vmatpush3.xpose.msk.msra.mxu1 %vm375_vm2, %v1093_v0  ;;  %1578 = vmatprep.mubr.msk.f32.mxu1 %vm1892_vm0, %v1893_v1 }
 0x805   : > { %1579 = vmatmul.mubr.msk.f32.vlgmr.msra.gmra.mrb[12].mxu1 %vm375_vm2, %v1091_v3 }
 0x8d4   : > { %v1011_v5 = vpop.f32.mrb[10].mxu1 }
 0x8d5   : > { %v1570_v6 = vpop.f32.mrb[11].mxu1  ;;  %1574 = vmatmul.mubr.msk.f32.vlgmr.msra.gmra.mrb[2].mxu0 %vm375_vm2, %v1011_v5 }
 0x8d6   : > { %1583 = vmatprep.mubr.msk.f32.mxu0 %vm1892_vm0, %v1893_v1 }
 0x8d8   : > { %v1164_v7 = vpop.f32.mrb[12].mxu1 }
 0x8d9   : > { %v1165_v8 = vadd.f32 %v2157_v16, %v1164_v7  ;;  %v1580_v9 = vpop.f32.mrb[13].mxu1 }
 0x8db   : > { %v1168_v10 = vsel %vm375_vm2, %v1165_v8, -inf }
 0x8dc   : > { %1169 = vmax.xlane.f32.xlu1 %v1168_v10 }
 0x969   : > { %v1170_v11 = vpop.xlane.xlu1 %1169 }
 0x96a   : > { %v1171_v12 = vsub.f32 %v1165_v8, %v1170_v11 }
 0x96c   : > { %v1172_v13 = vmul.f32 1.442695, %v1171_v12 }
 0x96e   : > { %1708 = vpow2.f32 %v1172_v13 }
 0x978   : > { %v1709_v14 = vpop.eup %1708 }
 0x979   : > { %v1174_v17 = vsel %vm375_vm2, %v1709_v14, 0.0 }
 0x97a   : > { %1175 = vadd.xlane.f32.xlu0 %v1174_v17 }
 0x990   : > { %1179 = vrot.lane.b32.xlu0 %v2146_v15, %s1898_s9 }
 0xa07   : > { %v1176_v18 = vpop.xlane.xlu0 %1175 }
 0xa08   : > { %1710 = vrcp.f32 %v1176_v18 }
 0xa0b   : > { %v1180_v16 = vpop.permute.xlu0 %1179 }
 0xa0c   : > { %1582 = vmatpush3.msra.mxu0 %v1180_v16 }
 0xa0d   : > { %1586 = vmatprep.subr.mxu0 %v1893_v1 }
 0xa12   : > { %v1711_v19 = vpop.eup %1710 }
 0xa13   : > { %v1178_v20 = vmul.f32 %v1711_v19, %v1709_v14 }
 0xa15   : > { %1584 = vmatmul.mubr.msk.f32.vlgmr.msra.gmra.mrb[4].mxu0 %vm375_vm2, %v1178_v20 }
 0xa16   : > { %1587 = vmatpush3.msra.mxu0 %v1255_v21  ;;  %1588 = vmatprep.mubr.msk.f32.mxu0 %vm1892_vm0, %v1893_v1 }
 0xae8   : > { %v1251_v22 = vpop.f32.mrb[4].mxu0 }
 0xae9   : > { %v1585_v15 = vpop.f32.mrb[5].mxu0  ;;  %1589 = vmatmul.mubr.msk.f32.vlgmr.msra.gmra.mrb[2].mxu0 %vm375_vm2, %v1251_v22 }
 0xbbc   : > { %v1325_v23 = vpop.f32.mrb[2].mxu0 }
 0xbbd   : > { %1331 = vst.msk [vmem:[%s266_s24] sm:$0xff] %vm279_vm1, %v1325_v23  ;;  %v1590_v1 = vpop.f32.mrb[3].mxu0 }
 0xbbe   : > { %1811 = shalt.err (!%p1808_p0)
}
 0xbbf   : > { %s1812_s28 = scalar_lea.hbm %s2231_s23, 128  ;;  %s1816_s14 = scalar_lea.hbm %s2285_s4, 256 }
 0xbc0   : > { %p1813_p4 = scmp.ne.s32.totalorder %s2231_s23, %s1812_s28  ;;  %p1817_p7 = scmp.lt.u32.totalorder %s2231_s23, %s2285_s4 }
 0xbc1   : > { %p1818_p2 = scmp.lt.u32.totalorder %s1816_s14, %s1812_s28  ;;  %p1820_p12 = scmp.lt.u32.totalorder %s1812_s28, %s2231_s23 }
 0xbc2   : > { %p1814_p13 = pnand %p1813_p4, %p2300_p1 }
 0xbc3   : > { %p1819_p8 = por %p1818_p2, %p1817_p7 }
 0xbc4   : > { %p1815_p6 = pneg %p1814_p13 }
 0xbc5   : > { %p1821_p10 = por %p1820_p12, %p1819_p8 }
 0xbc7   : > { %p1822_p3 = pnand %p1821_p10, %p1815_p6 }
 0xbc9   : > { %1825 = shalt.err (!%p1822_p3)
}
 0xbca   : > { %1613 = dma.vmem_to_hbm [thread:$0]  (%p2300_p1), %s2233_s7, 128, %s2231_s23, %s1333_s25  }
 0xbcb PF: > { %s1359_s11 = sand.u32 1, %s1864_s15   ;;  %p2301_p5 = scmp.ne.s32.totalorder %s2293_s26, 0 }
 0xbcc   : > { %p2302_p9 = scmp.ge.s32.totalorder %s1884_s20, 2  ;;  %s1360_s24 = scalar_lea.sflag [#allocation7], %s1359_s11 }
 0xbce   : > { %p1627_p11 = pnand %p2302_p9, %p2301_p5 }
 0xbd0   : > { %1859 = dma.done.wait (!%p1627_p11), %s1360_s24, 128  }
 0xbd1   : > { %1861 = vsyncadd (!%p1627_p11), %s1360_s24, 4294967168  ;;  %s21_s20 = sadd.s32 1, %s1884_s20   ;;  %s2303_s15 = smov %s1868_s16 }
 0xbd2   : > { %p18_p0 = scmp.ge.s32.totalorder %s21_s20, 4   ;;  %s2304_s16 = smov %s1872_s17 }
 0xbd3   : > { %s2305_s17 = smov %s2067_s22  ;;  %s2306_s18 = smov %s1880_s19 }
 0xbd4   : > { %s2307_s19 = smov %s2309_s5  ;;  %20 = sbr.rel (!%p18_p0) target bundleno = 7 (0x7), region = 97 }
 0xbdb   :  { %1365 = vsyncpa [#allocation6], 1 }
 0xbdc   :  { %1367 = vsyncpa [#allocation6 + $0x1], 1 }
 0xbdd   :  { %1368 = vsyncpa [#allocation9], 1 }
 0xbde   :  { %1369 = vsyncpa [#allocation7], 1 }
 0xbdf   :  { %1371 = vsyncpa [#allocation7 + $0x1], 1 }

</bundles_post_ra>
